<compile_context>
chip_gen: v6e
topology: v6e:2x2x1
jax: 0.10.0
libtpu: 0.0.40
codegen_flags: <defaults>
</compile_context>

<pallas_src>
import math

import jax
import jax.numpy as jnp
import numpy as np
from jax.experimental import pallas as pl
from jax.experimental.pallas import tpu as pltpu


def make_freqs(pos_dim: int, enc_dim: int) -> np.ndarray:
    """Deterministic parameter construction, mirroring PositionalEncoding.__init__."""
    assert enc_dim % (pos_dim * 2) == 0, (
        "dimension of positional encoding must be equal to dim * 2."
    )
    enc_half = enc_dim // 2
    div_term = np.exp(
        np.arange(0.0, enc_half, 2.0, dtype=np.float32)
        * -(math.log(10000.0) / enc_half)
    )  # [enc_half // 2]
    row = np.concatenate([div_term, div_term], axis=0)  # [enc_half]
    return np.tile(row[None, :], (pos_dim, 1)).astype(np.float32)  # [pos_dim, enc_half]


def _make_kernel(pos_dim: int, out_dim: int):
    def kernel(tab_ref, pos_ref, out_ref):
        # tab_ref: [pos_dim + 1, out_dim] VMEM
        #   rows 0..pos_dim-1 : freqs row d duplicated ([f_d | f_d])
        #   row  pos_dim      : phase row ([0...0 | pi/2...pi/2])
        # pos_ref: [tile_n, pos_dim] VMEM
        # out_ref: [tile_n, out_dim] VMEM
        pos = pos_ref[...]                              # [tile_n, pos_dim] f32
        pe = tab_ref[pos_dim : pos_dim + 1, :]          # phase, [1, out_dim]
        for d in range(pos_dim):                        # 4 broadcast FMAs on the VPU
            pe = pe + pos[:, d : d + 1] * tab_ref[d : d + 1, :]
        # sin over the doubled argument gives [sin(pe) | cos(pe)] in one shot.
        # TODO(synk): for peak throughput, restructure the output as a lane-dense
        # [N//4, 128] slab (or transposed layout) so sin() runs at full 128-lane
        # VPU utilization instead of 32/128 lanes.
        out_ref[...] = jnp.sin(pe).astype(out_ref.dtype)

    return kernel


def positional_encoding(pos: jnp.ndarray, freqs) -> jnp.ndarray:
    """pos: [..., pos_dim] float, freqs: [pos_dim, enc_half] float32
    returns: [..., 2 * enc_half] float32 (== original enc_dim)."""
    freqs = jnp.asarray(freqs, dtype=jnp.float32)
    pos_dim, enc_half = freqs.shape
    out_dim = 2 * enc_half
    assert pos.shape[-1] == pos_dim

    lead = pos.shape[:-1]
    n = int(math.prod(lead)) if lead else 1
    pos2d = pos.reshape(n, pos_dim).astype(jnp.float32)

    # Constant table: duplicated freq rows + phase row (tiny, fetched once).
    phase_row = jnp.concatenate(
        [jnp.zeros((1, enc_half), jnp.float32),
         jnp.full((1, enc_half), jnp.pi / 2.0, jnp.float32)],
        axis=1,
    )
    table = jnp.concatenate(
        [jnp.concatenate([freqs, freqs], axis=1), phase_row], axis=0
    )  # [pos_dim + 1, out_dim]

    # Row tiling: big double-buffered blocks, sized for VMEM (lane-padded
    # in+out buffers ~16 MiB at 8192 rows -> safe on v5e/v6e/v7x).
    TILE_N_MAX = 8192  # multiple of 8
    tile_n = n if n <= TILE_N_MAX else TILE_N_MAX
    grid = (pl.cdiv(n, tile_n),)

    cost = pl.CostEstimate(
        flops=2 * n * pos_dim * out_dim,
        transcendentals=n * out_dim,
        bytes_accessed=4 * n * (pos_dim + out_dim),
    )

    out = pl.pallas_call(
        _make_kernel(pos_dim, out_dim),
        out_shape=jax.ShapeDtypeStruct((n, out_dim), jnp.float32),
        grid=grid,
        in_specs=[
            pl.BlockSpec((pos_dim + 1, out_dim), lambda i: (0, 0)),  # table (untiled)
            pl.BlockSpec((tile_n, pos_dim), lambda i: (i, 0)),       # pos rows
        ],
        out_specs=pl.BlockSpec((tile_n, out_dim), lambda i: (i, 0)),
        compiler_params=pltpu.CompilerParams(
            dimension_semantics=("parallel",),      # shard row tiles across TCs (v7x)
            vmem_limit_bytes=32 * 1024 * 1024,
        ),
        cost_estimate=cost,
    )(table, pos2d)

    return out.reshape(*lead, out_dim)


if __name__ == "__main__":
    # Module config: pos_dim=4, enc_dim=32  (32 % (4*2) == 0)
    pos_dim, enc_dim = 4, 32
    freqs = make_freqs(pos_dim, enc_dim)  # [4, 16]

    key = jax.random.PRNGKey(0)
    # pos: [batch=2, seq=8, pos_dim=4]
    pos = jax.random.normal(key, (2, 8, pos_dim), dtype=jnp.float32)

    out = positional_encoding(pos, freqs)
    out = jax.block_until_ready(out)

    # Reference check in plain JAX (same math as the PyTorch forward).
    pe_ref = jnp.matmul(pos, jnp.asarray(freqs))
    ref = jnp.concatenate([jnp.sin(pe_ref), jnp.cos(pe_ref)], axis=-1)
    assert out.shape == (2, 8, enc_dim), out.shape
    assert jnp.allclose(out, ref, atol=1e-5, rtol=1e-5), float(
        jnp.max(jnp.abs(out - ref))
    )

    print("KERNEL_OK")
</pallas_src>

<mosaic_0001>
module attributes {stable_mosaic.version = 11 : i64} {
  func.func @kernel(%arg0: i32, %arg1: memref<5x32xf32, #tpu.memory_space<vmem>>, %arg2: memref<16x4xf32, #tpu.memory_space<vmem>>, %arg3: memref<16x32xf32, #tpu.memory_space<vmem>>) attributes {dimension_semantics = [#tpu.dimension_semantics<parallel>], iteration_bounds = array<i64: 1>, scalar_prefetch = 0 : i64, scratch_operands = 0 : i64, tpu.core_type = #tpu.core_type<tc>, window_params = [{pipeline_mode = #tpu.pipeline_mode<synchronous>, transform_indices = @transform_0, window_bounds = array<i64: 5, 32>}, {transform_indices = @transform_1, window_bounds = array<i64: 16, 4>}, {transform_indices = @transform_2, window_bounds = array<i64: 16, 32>}]} {
    %c0 = arith.constant 0 : index
    %c0_0 = arith.constant 0 : index
    %0 = vector.load %arg2[%c0, %c0_0] : memref<16x4xf32, #tpu.memory_space<vmem>>, vector<16x4xf32>
    %c4 = arith.constant 4 : index
    %c0_1 = arith.constant 0 : index
    %1 = vector.load %arg1[%c4, %c0_1] : memref<5x32xf32, #tpu.memory_space<vmem>>, vector<1x32xf32>
    %2 = vector.extract_strided_slice %0 {offsets = [0, 0], sizes = [16, 1], strides = [1, 1]} : vector<16x4xf32> to vector<16x1xf32>
    %c0_2 = arith.constant 0 : index
    %c0_3 = arith.constant 0 : index
    %3 = vector.load %arg1[%c0_2, %c0_3] : memref<5x32xf32, #tpu.memory_space<vmem>>, vector<1x32xf32>
    %4 = vector.broadcast %2 : vector<16x1xf32> to vector<16x32xf32>
    %5 = vector.broadcast %3 : vector<1x32xf32> to vector<16x32xf32>
    %6 = arith.mulf %4, %5 : vector<16x32xf32>
    %7 = vector.broadcast %1 : vector<1x32xf32> to vector<16x32xf32>
    %8 = arith.addf %7, %6 : vector<16x32xf32>
    %9 = vector.extract_strided_slice %0 {offsets = [0, 1], sizes = [16, 1], strides = [1, 1]} : vector<16x4xf32> to vector<16x1xf32>
    %c1 = arith.constant 1 : index
    %c0_4 = arith.constant 0 : index
    %10 = vector.load %arg1[%c1, %c0_4] : memref<5x32xf32, #tpu.memory_space<vmem>>, vector<1x32xf32>
    %11 = vector.broadcast %9 : vector<16x1xf32> to vector<16x32xf32>
    %12 = vector.broadcast %10 : vector<1x32xf32> to vector<16x32xf32>
    %13 = arith.mulf %11, %12 : vector<16x32xf32>
    %14 = arith.addf %8, %13 : vector<16x32xf32>
    %15 = vector.extract_strided_slice %0 {offsets = [0, 2], sizes = [16, 1], strides = [1, 1]} : vector<16x4xf32> to vector<16x1xf32>
    %c2 = arith.constant 2 : index
    %c0_5 = arith.constant 0 : index
    %16 = vector.load %arg1[%c2, %c0_5] : memref<5x32xf32, #tpu.memory_space<vmem>>, vector<1x32xf32>
    %17 = vector.broadcast %15 : vector<16x1xf32> to vector<16x32xf32>
    %18 = vector.broadcast %16 : vector<1x32xf32> to vector<16x32xf32>
    %19 = arith.mulf %17, %18 : vector<16x32xf32>
    %20 = arith.addf %14, %19 : vector<16x32xf32>
    %21 = vector.extract_strided_slice %0 {offsets = [0, 3], sizes = [16, 1], strides = [1, 1]} : vector<16x4xf32> to vector<16x1xf32>
    %c3 = arith.constant 3 : index
    %c0_6 = arith.constant 0 : index
    %22 = vector.load %arg1[%c3, %c0_6] : memref<5x32xf32, #tpu.memory_space<vmem>>, vector<1x32xf32>
    %23 = vector.broadcast %21 : vector<16x1xf32> to vector<16x32xf32>
    %24 = vector.broadcast %22 : vector<1x32xf32> to vector<16x32xf32>
    %25 = arith.mulf %23, %24 : vector<16x32xf32>
    %26 = arith.addf %20, %25 : vector<16x32xf32>
    %27 = math.sin %26 : vector<16x32xf32>
    %c0_7 = arith.constant 0 : index
    %c0_8 = arith.constant 0 : index
    %28 = vector.load %arg3[%c0_7, %c0_8] : memref<16x32xf32, #tpu.memory_space<vmem>>, vector<16x32xf32>
    tpu.vector_store %arg3[%c0_7, %c0_8], %27 {strides = array<i32>} : memref<16x32xf32, #tpu.memory_space<vmem>>, vector<16x32xf32>,
    return
  }
  func.func @transform_0(%arg0: i32) -> (i32, i32) {
    %c0_i32 = arith.constant 0 : i32
    %c0_i32_0 = arith.constant 0 : i32
    %c0_i32_1 = arith.constant 0 : i32
    return %c0_i32, %c0_i32_0 : i32, i32
  }
  func.func @transform_1(%arg0: i32) -> (i32, i32) {
    %c0_i32 = arith.constant 0 : i32
    %c0_i32_0 = arith.constant 0 : i32
    return %arg0, %c0_i32 : i32, i32
  }
  func.func @transform_2(%arg0: i32) -> (i32, i32) {
    %c0_i32 = arith.constant 0 : i32
    %c0_i32_0 = arith.constant 0 : i32
    return %arg0, %c0_i32 : i32, i32
  }
}

</mosaic_0001>

<bundles_post_ra>
// kernel: tpu_custom_call.1
= control target key start
LH: loop header
LB: loop body
LE: loop exit
PB: predicated region body
PF: predicated region fallthrough
CT: control target
= control target key end

     0   :  { %v386_v1 = vmov 1   ;;  %v387_v2 = vmov 0   ;;  %s518_s0 = inlined_call_operand.vmem [shape: f32[5,32], index: 0, kind: input, shape index: {}]   ;;  %s519_s1 = inlined_call_operand.vmem [shape: f32[16,4], index: 1, kind: input, shape index: {}]   ;;  %s520_s2 = inlined_call_operand.hbm [shape: f32[16,32], index: 2, kind: output, shape index: {}]  }
   0x1   :  { %v12_v0 = vld [vmem:[%s519_s1] sm:$0xff]  ;;  %351 = vset.pattern.permute.xlu1 %v386_v1  ;;  %350 = vset.pattern.permute.xlu0 %v387_v2 }
   0x2   :  { %40 = vperm.xlu1 %351, %v12_v0   ;;  %18 = vperm.xlu0 %350, %v12_v0  }
   0x3   :  { %7 = vsyncpa [#allocation3], 0  ;;  %v13_v3 = vld [vmem:[%s519_s1 + $0x8] sm:$0xff]  ;;  %v388_v4 = vmov 2   ;;  %v389_v5 = vmov 3  }
   0x4   :  { %v316_v8 = vld [vmem:[%s518_s0] ss:$0 sm:$0xff]  ;;  %v317_v13 = vld [vmem:[%s518_s0 + $0x4] ss:$0 sm:$0xff]  ;;  %v318_v15 = vld [vmem:[%s518_s0 + $0x1] ss:$0 sm:$0xff] }
   0x5   :  { %v319_v16 = vld [vmem:[%s518_s0 + $0x2] ss:$0 sm:$0xff]  ;;  %v320_v25 = vld [vmem:[%s518_s0 + $0x3] ss:$0 sm:$0xff]  ;;  %v390_v55 = vmov 683565275  }
   0x6   :  { %44 = vperm.xlu1 %351, %v13_v3   ;;  %23 = vperm.xlu0 %350, %v13_v3   ;;  %v391_v59 = vmov 2475754826   ;;  %v392_v61 = vmov 2131351028   ;;  %v393_v63 = vmov 2102212464  }
   0x7   :  { %v394_v1 = vmov 920167782   ;;  %s396_s0 = smov [#allocation2]  }
   0x8   :  { %s305_s22 = sshll.u32 %s396_s0, 4  ;;  %s306_s22 = int_to_ptr.vmem [resolvable:$true] %s305_s22 }
   0x9   :  { %s364_s23 = scalar_lea.vmem %s306_s22, 256  ;;  %p369_p1 = scmp.lt.s32.totalorder %s306_s22, %s306_s22 }
   0xa   :  { %353 = vset.pattern.permute.xlu1 %v388_v4  ;;  %352 = vset.pattern.permute.xlu0 %v388_v4  ;;  %p365_p0 = scmp.ne.s32.totalorder %s306_s22, %s364_s23  ;;  %p370_p2 = scmp.lt.s32.totalorder %s364_s23, %s364_s23 }
   0xb   :  { %61 = vperm.xlu1 %353, %v13_v3   ;;  %57 = vperm.xlu0 %352, %v12_v0  }
   0xc   :  { %p371_p3 = por %p370_p2, %p369_p1 }
   0xe   :  { %p372_p4 = pnand %p371_p3, %p365_p0 }
   0xf   :  { %354 = vset.pattern.permute.xlu1 %v389_v5  ;;  %355 = vset.pattern.permute.xlu0 %v389_v5 }
  0x10   :  { %74 = vperm.xlu1 %354, %v12_v0   ;;  %78 = vperm.xlu0 %355, %v13_v3  }
  0x7d   :  { %v41_v6 = vpop.permute.xlu1 %40  ;;  %v19_v7 = vpop.permute.xlu0 %18 }
  0x7e   :  { %v30_v11 = vmul.f32 %v316_v8, %v19_v7  ;;  %v51_v21 = vmul.f32 %v318_v15, %v41_v6 }
  0x80   :  { %v36_v17 = vadd.f32 %v317_v13, %v30_v11 }
  0x81   :  { %v45_v9 = vpop.permute.xlu1 %44  ;;  %v24_v10 = vpop.permute.xlu0 %23 }
  0x82   :  { %v31_v12 = vmul.f32 %v316_v8, %v24_v10  ;;  %v52_v18 = vmul.f32 %v318_v15, %v45_v9  ;;  %v53_v26 = vadd.f32 %v51_v21, %v36_v17  ;;  %v395_v8 = vmov 1326507024  }
  0x84   :  { %v37_v14 = vadd.f32 %v317_v13, %v31_v12 }
  0x86   :  { %v62_v19 = vpop.permute.xlu1 %61  ;;  %v58_v20 = vpop.permute.xlu0 %57  ;;  %v54_v22 = vadd.f32 %v52_v18, %v37_v14 }
  0x87   :  { %v69_v23 = vmul.f32 %v319_v16, %v62_v19  ;;  %v68_v24 = vmul.f32 %v319_v16, %v58_v20 }
  0x89   :  { %v71_v29 = vadd.f32 %v69_v23, %v54_v22  ;;  %v70_v30 = vadd.f32 %v68_v24, %v53_v26 }
  0x8b   :  { %v75_v27 = vpop.permute.xlu1 %74  ;;  %v79_v28 = vpop.permute.xlu0 %78 }
  0x8c   :  { %v85_v31 = vmul.f32 %v320_v25, %v75_v27  ;;  %v86_v32 = vmul.f32 %v320_v25, %v79_v28 }
  0x8e   :  { %v435_v33 = vadd.f32 %v85_v31, %v70_v30  ;;  %v437_v34 = vadd.f32 %v86_v32, %v71_v29 }
  0x90   :  { %v89_v35 = vand.u32 2147483647, %v435_v33  ;;  %v92_v36 = vand.u32 2139095040, %v435_v33  ;;  %v196_v37 = vand.u32 2139095040, %v437_v34  ;;  %v193_v40 = vand.u32 2147483647, %v437_v34 }
  0x91   :  { %vm91_vm14 = vcmp.lt.s32.totalorder %v435_v33, 0 }
  0x92   :  { %v93_v38 = vshrl.u32 %v92_v36, 23  ;;  %v96_v39 = vand.u32 8388607, %v89_v35  ;;  %v197_v41 = vshrl.u32 %v196_v37, 23  ;;  %v447_v46 = vand.u32 8388607, %v193_v40 }
  0x93   :  { %vm490_vm15 = vcmp.le.f32.partialorder %v89_v35, 0.7853982 }
  0x94   :  { %v321_v42 = vadd.s32 4294967169, %v93_v38  ;;  %v325_v43 = vadd.s32 4294967169, %v197_v41  ;;  %v97_v45 = vor.u32 8388608, %v96_v39  ;;  %v201_v53 = vor.u32 8388608, %v447_v46 }
  0x96   :  { %v99_v44 = vadd.s32 1, %v321_v42  ;;  %v203_v47 = vadd.s32 1, %v325_v43  ;;  %v449_v52 = vshll.u32 %v97_v45, 8 }
  0x98   :  { %vm100_vm0 = vcmp.gt.s32.totalorder %v99_v44, 0  ;;  %vm204_vm1 = vcmp.gt.s32.totalorder %v203_v47, 0 }
  0x99   :  { %v101_v48 = vsel %vm100_vm0, %v99_v44, 0  ;;  %v205_v51 = vsel %vm204_vm1, %v203_v47, 0  ;;  %v241_v47 = vshll.u32 %v201_v53, 8  ;;  %vm195_vm0 = vcmp.lt.s32.totalorder %v437_v34, 0 }
  0x9a   :  { %v102_v49 = vshrl.u32 %v101_v48, 5  ;;  %v103_v50 = vand.u32 31, %v101_v48  ;;  %v452_v57 = vshrl.u32 %v205_v51, 5  ;;  %v207_v58 = vand.u32 31, %v205_v51 }
  0x9b   :  { %vm502_vm1 = vcmp.le.f32.partialorder %v193_v40, 0.7853982 }
  0x9c   :  { %v104_v54 = vsub.s32 32, %v103_v50  ;;  %v106_v56 = vshll.u32 %v390_v55, %v103_v50  ;;  %v109_v60 = vshll.u32 %v391_v59, %v103_v50  ;;  %v112_v62 = vshll.u32 %v392_v61, %v103_v50 }
  0x9d   :  { %v115_v0 = vshll.u32 %v393_v63, %v103_v50  ;;  %v118_v2 = vshll.u32 %v394_v1, %v103_v50  ;;  %vm121_vm2 = vcmp.lt.s32.totalorder %v102_v49, 1  ;;  %vm122_vm3 = vcmp.lt.s32.totalorder %v102_v49, 2 }
  0x9e   :  { %v107_v3 = vshrl.u32 %v391_v59, %v104_v54  ;;  %v110_v4 = vshrl.u32 %v392_v61, %v104_v54  ;;  %v113_v5 = vshrl.u32 %v393_v63, %v104_v54  ;;  %v105_v6 = vshrl.u32 %v390_v55, %v104_v54 }
  0x9f   :  { %v116_v7 = vshrl.u32 %v394_v1, %v104_v54  ;;  %v119_v9 = vshrl.u32 %v395_v8, %v104_v54  ;;  %v208_v13 = vsub.s32 32, %v207_v58  ;;  %vm123_vm4 = vcmp.lt.s32.totalorder %v102_v49, 3 }
  0xa0   :  { %v108_v10 = vor.u32 %v107_v3, %v106_v56  ;;  %v111_v11 = vor.u32 %v110_v4, %v109_v60  ;;  %v114_v12 = vor.u32 %v113_v5, %v112_v62  ;;  %vm124_vm5 = vcmp.lt.s32.totalorder %v102_v49, 4 }
  0xa1   :  { %v117_v14 = vor.u32 %v116_v7, %v115_v0  ;;  %v120_v15 = vor.u32 %v119_v9, %v118_v2  ;;  %v210_v23 = vshll.u32 %v390_v55, %v207_v58  ;;  %v211_v26 = vshrl.u32 %v391_v59, %v208_v13 }
  0xa2   :  { %v125_v16 = vsel %vm121_vm2, %v105_v6, %v108_v10  ;;  %v126_v17 = vsel %vm124_vm5, %v114_v12, 2102212464  ;;  %v129_v18 = vsel %vm121_vm2, %v108_v10, %v111_v11  ;;  %v133_v19 = vsel %vm121_vm2, %v111_v11, %v114_v12 }
  0xa3   :  { %v127_v20 = vsel %vm123_vm4, %v111_v11, %v126_v17  ;;  %v130_v21 = vsel %vm124_vm5, %v117_v14, 920167782  ;;  %v134_v22 = vsel %vm124_vm5, %v120_v15, 1326507024  ;;  %v213_v27 = vshll.u32 %v391_v59, %v207_v58 }
  0xa4   :  { %v131_v24 = vsel %vm123_vm4, %v114_v12, %v130_v21  ;;  %v135_v25 = vsel %vm123_vm4, %v117_v14, %v134_v22  ;;  %v128_v28 = vsel %vm122_vm3, %v125_v16, %v127_v20  ;;  %v214_v31 = vshrl.u32 %v392_v61, %v208_v13 }
  0xa5   :  { %v132_v29 = vsel %vm122_vm3, %v129_v18, %v131_v24  ;;  %v136_v30 = vsel %vm122_vm3, %v133_v19, %v135_v25  ;;  %v212_v39 = vor.u32 %v211_v26, %v210_v23  ;;  %v216_v42 = vshll.u32 %v392_v61, %v207_v58 }
  0xa6   :  { %v461_v32 = vmul.u32.u64.low %v449_v52, %v136_v30  ;;  %v462_v36 = vmul.u32.u64.high %v449_v52, %v136_v30, %v461_v32  ;;  %v465_v37 = vmul.u32.u64.low %v449_v52, %v132_v29  ;;  %v466_v38 = vmul.u32.u64.high %v449_v52, %v132_v29, %v465_v37 }
  0xa7   :  { %v215_v41 = vor.u32 %v214_v31, %v213_v27  ;;  %v217_v43 = vshrl.u32 %v393_v63, %v208_v13  ;;  %v219_v44 = vshll.u32 %v393_v63, %v207_v58  ;;  %v220_v45 = vshrl.u32 %v394_v1, %v208_v13 }
  0xa8   :  { %v223_v46 = vshrl.u32 %v395_v8, %v208_v13  ;;  %v144_v48 = vmul.u32 %v449_v52, %v128_v28  ;;  %v209_v49 = vshrl.u32 %v390_v55, %v208_v13  ;;  %v222_v51 = vshll.u32 %v394_v1, %v207_v58 }
  0xa9   :  { %v218_v50 = vor.u32 %v217_v43, %v216_v42  ;;  %vm146_vm6 = vc.u32 %v462_v36, %v465_v37  ;;  %v147_v54 = vadd.s32 1, %v466_v38  ;;  %v221_v56 = vor.u32 %v220_v45, %v219_v44 }
  0xaa   :  { %vm225_vm7 = vcmp.lt.s32.totalorder %v452_v57, 1  ;;  %v224_v59 = vor.u32 %v223_v46, %v222_v51  ;;  %vm227_vm8 = vcmp.lt.s32.totalorder %v452_v57, 3  ;;  %vm228_vm9 = vcmp.lt.s32.totalorder %v452_v57, 4 }
  0xab   :  { %v233_v60 = vsel %vm225_vm7, %v212_v39, %v215_v41  ;;  %v148_v53 = vsel %vm146_vm6, %v147_v54, %v466_v38  ;;  %v230_v61 = vsel %vm228_vm9, %v218_v50, 2102212464  ;;  %v234_v52 = vsel %vm228_vm9, %v221_v56, 920167782 }
  0xac   :  { %v237_v55 = vsel %vm225_vm7, %v215_v41, %v218_v50  ;;  %v149_v62 = vadd.s32 %v148_v53, %v144_v48  ;;  %vm226_vm10 = vcmp.lt.s32.totalorder %v452_v57, 2  ;;  %v235_v58 = vsel %vm227_vm8, %v218_v50, %v234_v52 }
  0xad   :  { %v238_v63 = vsel %vm228_vm9, %v224_v59, 1326507024  ;;  %v229_v0 = vsel %vm225_vm7, %v209_v49, %v212_v39  ;;  %v231_v1 = vsel %vm227_vm8, %v215_v41, %v230_v61  ;;  %v236_v2 = vsel %vm226_vm10, %v233_v60, %v235_v58 }
  0xae   :  { %v239_v3 = vsel %vm227_vm8, %v221_v56, %v238_v63  ;;  %v150_v4 = vadd.s32 536870912, %v149_v62  ;;  %v476_v6 = vmul.u32.u64.low %v241_v47, %v236_v2  ;;  %v477_v7 = vmul.u32.u64.high %v241_v47, %v236_v2, %v476_v6 }
  0xaf   :  { %v240_v5 = vsel %vm226_vm10, %v237_v55, %v239_v3  ;;  %v232_v11 = vsel %vm226_vm10, %v229_v0, %v231_v1  ;;  %v145_v27 = vadd.s32 %v465_v37, %v462_v36  ;;  %vm297_vm5 = vcmask 261120  }
  0xb0   :  { %v479_v8 = vmul.u32.u64.low %v241_v47, %v240_v5  ;;  %v480_v9 = vmul.u32.u64.high %v241_v47, %v240_v5, %v479_v8  ;;  %v151_v10 = vshrl.u32 %v150_v4, 30  ;;  %v251_v13 = vadd.s32 1, %v477_v7 }
  0xb1   :  { %v248_v57 = vmul.u32 %v241_v47, %v232_v11  ;;  %vm181_vm6 = vweird.f32 %v435_v33  ;;  %vm285_vm10 = vweird.f32 %v437_v34 }
  0xb2   :  { %v152_v12 = vshll.u32 %v151_v10, 30  ;;  %vm250_vm11 = vc.u32 %v480_v9, %v476_v6  ;;  %v249_v48 = vadd.s32 %v476_v6, %v480_v9  ;;  %v175_v59 = vsub.s32 4, %v151_v10 }
  0xb3   :  { %v252_v15 = vsel %vm250_vm11, %v251_v13, %v477_v7 }
  0xb4   :  { %v153_v14 = vsub.s32 %v149_v62, %v152_v12  ;;  %v253_v16 = vadd.s32 %v252_v15, %v248_v57  ;;  %v176_v58 = vsel %vm91_vm14, %v175_v59, %v151_v10 }
  0xb5   :  { %v178_v2 = vsel %vm490_vm15, 0, %v176_v58 }
  0xb6   :  { %v155_v17 = vsub.s32 0, %v153_v14  ;;  %v254_v18 = vadd.s32 536870912, %v253_v16  ;;  %v182_v6 = vadd.s32 3, %v178_v2 }
  0xb8   :  { %v322_v19 = vmin.u32 %v155_v17, %v153_v14  ;;  %v255_v20 = vshrl.u32 %v254_v18, 30  ;;  %v183_v9 = vand.u32 3, %v182_v6 }
  0xba   :  { %v157_v21 = vclz %v322_v19  ;;  %v256_v22 = vshll.u32 %v255_v20, 30  ;;  %v279_v35 = vsub.s32 4, %v255_v20  ;;  %vm188_vm2 = vcmp.eq.s32.totalorder %v183_v9, 2 }
  0xbb   :  { %vm185_vm3 = vcmp.eq.s32.totalorder %v183_v9, 0  ;;  %vm184_vm4 = vcmp.lt.s32.totalorder %v183_v9, 2 }
  0xbc   :  { %v323_v23 = vadd.s32 4294967294, %v157_v21  ;;  %v257_v24 = vsub.s32 %v253_v16, %v256_v22  ;;  %v280_v8 = vsel %vm195_vm0, %v279_v35, %v255_v20 }
  0xbd   :  { %v282_v11 = vsel %vm502_vm1, 0, %v280_v8 }
  0xbe   :  { %vm324_vm12 = vcmp.lt.s32.totalorder %v323_v23, 0  ;;  %v259_v26 = vsub.s32 0, %v257_v24 }
  0xbf   :  { %v160_v25 = vsel %vm324_vm12, 0, %v323_v23 }
  0xc0   :  { %v161_v28 = vsub.s32 32, %v160_v25  ;;  %v165_v29 = vsub.s32 4294967266, %v160_v25  ;;  %v326_v30 = vmin.u32 %v259_v26, %v257_v24  ;;  %v162_v31 = vshll.u32 %v153_v14, %v160_v25 }
  0xc1   :  { %v286_v14 = vadd.s32 3, %v282_v11 }
  0xc2   :  { %v163_v32 = vshrl.u32 %v145_v27, %v161_v28  ;;  %v166_v38 = vadd.s32 127, %v165_v29  ;;  %v261_v39 = vclz %v326_v30 }
  0xc3   :  { %v287_v18 = vand.u32 3, %v286_v14 }
  0xc4   :  { %v164_v41 = vor.u32 %v163_v32, %v162_v31  ;;  %v167_v42 = vshll.u32 %v166_v38, 23  ;;  %v327_v43 = vadd.s32 4294967294, %v261_v39 }
  0xc5   :  { %vm292_vm7 = vcmp.eq.s32.totalorder %v287_v18, 2  ;;  %vm289_vm8 = vcmp.eq.s32.totalorder %v287_v18, 0  ;;  %vm288_vm9 = vcmp.lt.s32.totalorder %v287_v18, 2 }
  0xc6   :  { %v168_v44 = vor.u32 4788187, %v167_v42  ;;  %vm328_vm13 = vcmp.lt.s32.totalorder %v327_v43, 0  ;;  %v171_v46 = vcvt.s32.f32 %v164_v41 }
  0xc7   :  { %v264_v47 = vsel %vm328_vm13, 0, %v327_v43 }
  0xc8   :  { %v169_v45 = vand.u32 2147483647, %v168_v44  ;;  %v265_v49 = vsub.s32 32, %v264_v47  ;;  %v269_v50 = vsub.s32 4294967266, %v264_v47  ;;  %v266_v37 = vshll.u32 %v257_v24, %v264_v47 }
  0xca   :  { %v172_v36 = vmul.f32 %v171_v46, %v169_v45  ;;  %v267_v51 = vshrl.u32 %v249_v48, %v265_v49  ;;  %v270_v54 = vadd.s32 127, %v269_v50 }
  0xcc   :  { %v173_v56 = vxor.u32 2147483648, %v172_v36  ;;  %v268_v60 = vor.u32 %v267_v51, %v266_v37  ;;  %v271_v53 = vshll.u32 %v270_v54, 23 }
  0xce   :  { %v174_v52 = vsel %vm91_vm14, %v173_v56, %v172_v36  ;;  %v272_v62 = vor.u32 4788187, %v271_v53  ;;  %v275_v0 = vcvt.s32.f32 %v268_v60 }
  0xcf   :  { %v177_v55 = vsel %vm490_vm15, %v435_v33, %v174_v52 }
  0xd0   :  { %356 = vcosq.f32 %v177_v55  ;;  %v273_v63 = vand.u32 2147483647, %v272_v62 }
  0xd1   :  { %358 = vsinq.f32 %v177_v55 }
  0xd2   :  { %v276_v1 = vmul.f32 %v275_v0, %v273_v63 }
  0xd4   :  { %v277_v3 = vxor.u32 2147483648, %v276_v1 }
  0xd6   :  { %v278_v5 = vsel %vm195_vm0, %v277_v3, %v276_v1 }
  0xd7   :  { %v281_v7 = vsel %vm502_vm1, %v437_v34, %v278_v5 }
  0xd8   :  { %360 = vcosq.f32 %v281_v7 }
  0xd9   :  { %362 = vsinq.f32 %v281_v7 }
  0xdd   :  { %v357_v10 = vpop.eup %356 }
  0xde   :  { %v359_v12 = vpop.eup %358  ;;  %v189_v13 = vxor.u32 2147483648, %v357_v10 }
  0xdf   :  { %v186_v40 = vxor.u32 2147483648, %v359_v12 }
  0xe0   :  { %v190_v57 = vsel %vm188_vm2, %v189_v13, %v359_v12 }
  0xe1   :  { %v187_v15 = vsel %vm185_vm3, %v357_v10, %v186_v40 }
  0xe2   :  { %v191_v16 = vsel %vm184_vm4, %v187_v15, %v190_v57 }
  0xe3   :  { %v192_v17 = vsel %vm181_vm6, nan, %v191_v16 }
  0xe4   :  { %298 = vst.msk [vmem:[#allocation2] sm:$0xff] %vm297_vm5, %v192_v17 }
  0xe5   :  { %v361_v19 = vpop.eup %360 }
  0xe6   :  { %v363_v20 = vpop.eup %362  ;;  %v293_v21 = vxor.u32 2147483648, %v361_v19 }
  0xe7   :  { %v290_v22 = vxor.u32 2147483648, %v363_v20 }
  0xe8   :  { %v294_v23 = vsel %vm292_vm7, %v293_v21, %v363_v20 }
  0xe9   :  { %v291_v24 = vsel %vm289_vm8, %v361_v19, %v290_v22 }
  0xea   :  { %v295_v25 = vsel %vm288_vm9, %v291_v24, %v294_v23 }
  0xeb   :  { %v296_v33 = vsel %vm285_vm10, nan, %v295_v25 }
  0xec   :  { %299 = vst.msk [vmem:[#allocation2 + $0x8] sm:$0xff] %vm297_vm5, %v296_v33 }
  0xed   :  { %375 = shalt.err (!%p372_p4)
}
  0xee   :  { %s397_s24 = smov 128   ;;  %s398_s25 = smov 8  }
  0xef   :  { %311 = dma.vmem_to_hbm [thread:$0]  %s306_s22, 256, %s520_s2, [#allocation3], %s397_s24, %s397_s24, %s398_s25  }
  0xf0   :  { %384 = dma.done.wait [#allocation3], 256  }
  0xf1   :  { %385 = vsyncadd [#allocation3], 4294967040 }
  0xf2   :  { %315 = vsyncpa [#allocation3], 1 }

</bundles_post_ra>
